<compile_context>
chip_gen: v7x
topology: tpu7x:2x2x1
jax: 0.10.0
libtpu: 0.0.40
codegen_flags: <defaults>
</compile_context>

<pallas_src>
import functools

import jax
import jax.numpy as jnp
from jax.experimental import pallas as pl
from jax.experimental.pallas import tpu as pltpu

EPS = 1e-7


def _flow_kernel(p_ref, pts_ref, out_ref, *, width, tile_n):
    """One (batch, pixel-tile) grid step.

    p_ref   : (3, 4)       P = (K @ T)[:3, :] for this batch (VMEM)
    pts_ref : (4, TILE_N)  homogeneous points for this pixel tile
    out_ref : (2, TILE_N)  optical-flow output tile
    """
    p = p_ref[...].astype(jnp.float32)        # (3, 4)
    pts = pts_ref[...].astype(jnp.float32)    # (4, TILE_N)

    # cam = P @ points via 12 broadcast MACs on the VPU (no tiny MXU matmuls).
    cam = p[:, 0:1] * pts[0:1, :]
    for j in range(1, 4):
        cam = cam + p[:, j:j + 1] * pts[j:j + 1, :]          # (3, TILE_N)

    # Depth division -> reciprocal (EUP path); approx=False keeps full precision.
    inv_z = pl.reciprocal(cam[2:3, :] + EPS, approx=False)
    pix_x = cam[0:1, :] * inv_z
    pix_y = cam[1:2, :] * inv_z

    # Pixel grid computed in-kernel (no (2, N) HBM input).  Flat index ->
    # (row, col) with exact-integer f32 arithmetic and a +/-1 fixup (valid for
    # N < 2^24 pixels, i.e. any realistic image).
    base = pl.program_id(1) * tile_n
    lane = jax.lax.broadcasted_iota(jnp.int32, (1, tile_n), 1)
    idx = (lane + base).astype(jnp.float32)                   # (1, TILE_N)
    wf = jnp.float32(width)
    row = jnp.floor(idx * jnp.float32(1.0 / width))           # approx idx // W
    rem = idx - row * wf
    row = jnp.where(rem < 0.0, row - 1.0, row)                # overshoot fixup
    row = jnp.where(rem >= wf, row + 1.0, row)                # undershoot fixup
    col = idx - row * wf                                      # exact idx % W

    # flow channel 0 = pix_y - row, channel 1 = pix_x - col; single fused store.
    out = jnp.concatenate([pix_y - row, pix_x - col], axis=0)  # (2, TILE_N)
    out_ref[...] = out.astype(out_ref.dtype)


def _pick_tile(n, batch):
    """Lane-dense tile: multiple of 128 (or all of n), large enough to amortize
    per-step overhead (cap 32768), small enough to leave >=2 total grid steps
    when batch == 1 (so both v7x TensorCores get work)."""
    if n <= 256:
        return n
    cap = 32768
    if batch < 2:
        cap = min(cap, pl.cdiv(n, 2))
    t = min(n, cap)
    return max(128, (t // 128) * 128)


@functools.partial(jax.jit, static_argnums=(3, 4))
def optical_flow(points, K, T, height, width):
    """Pallas port of optical_flow.forward.

    points : (B, 4, H*W) homogeneous points
    K, T   : (B, 4, 4)
    returns: (B, 2, H, W) float32
    """
    B = points.shape[0]
    N = height * width
    assert points.shape == (B, 4, N)
    tile_n = _pick_tile(N, B)
    num_tiles = pl.cdiv(N, tile_n)

    # Tiny per-batch projection computed once in the wrapper; halves in-kernel MACs.
    P = jnp.matmul(K.astype(jnp.float32), T.astype(jnp.float32))[:, :3, :]  # (B,3,4)

    kernel = functools.partial(_flow_kernel, width=width, tile_n=tile_n)

    out_flat = pl.pallas_call(
        kernel,
        out_shape=jax.ShapeDtypeStruct((B, 2, N), jnp.float32),
        grid_spec=pltpu.PrefetchScalarGridSpec(
            num_scalar_prefetch=0,
            grid=(B, num_tiles),
            in_specs=[
                pl.BlockSpec((None, 3, 4), lambda b, n: (b, 0, 0)),        # P
                pl.BlockSpec((None, 4, tile_n), lambda b, n: (b, 0, n)),   # points
            ],
            out_specs=pl.BlockSpec((None, 2, tile_n), lambda b, n: (b, 0, n)),
        ),
        compiler_params=pltpu.CompilerParams(
            dimension_semantics=("parallel", "parallel")),
    )(P, points)

    return out_flat.reshape(B, 2, height, width)


def _optical_flow_ref(points, K, T, height, width, eps=EPS):
    """Pure-JAX reference mirroring the PyTorch module exactly."""
    B = points.shape[0]
    P = jnp.matmul(K, T)[:, :3, :]
    cam = jnp.matmul(P, points)                              # (B, 3, N)
    pix = cam[:, :2, :] / (cam[:, 2:3, :] + eps)             # (B, 2, N)
    pix = pix.reshape(B, 2, height, width)
    rows = jax.lax.broadcasted_iota(jnp.float32, (height, width), 0)
    cols = jax.lax.broadcasted_iota(jnp.float32, (height, width), 1)
    grid = jnp.stack([rows, cols])[None]                     # (1, 2, H, W)
    return pix[:, ::-1, :, :] - grid


if __name__ == "__main__":
    key = jax.random.PRNGKey(0)
    kk, kt, kp = jax.random.split(key, 3)
    B, H, W = 2, 16, 16
    N = H * W

    K = jax.random.uniform(kk, (B, 4, 4), dtype=jnp.float32)
    T = jax.random.uniform(kt, (B, 4, 4), dtype=jnp.float32)
    xyz = jax.random.uniform(kp, (B, 3, N), dtype=jnp.float32)
    points = jnp.concatenate([xyz, jnp.ones((B, 1, N), jnp.float32)], axis=1)

    out = optical_flow(points, K, T, H, W)
    out = jax.block_until_ready(out)

    ref = _optical_flow_ref(points, K, T, H, W)
    assert out.shape == (B, 2, H, W)
    assert jnp.allclose(out, ref, atol=1e-4, rtol=1e-4), float(
        jnp.max(jnp.abs(out - ref)))
    print("KERNEL_OK")
</pallas_src>

<mosaic_0001>
module attributes {stable_mosaic.version = 11 : i64} {
  func.func @_flow_kernel(%arg0: i32, %arg1: i32, %arg2: memref<1x3x4xf32, #tpu.memory_space<vmem>>, %arg3: memref<1x4x256xf32, #tpu.memory_space<vmem>>, %arg4: memref<1x2x256xf32, #tpu.memory_space<vmem>>) attributes {dimension_semantics = [#tpu.dimension_semantics<parallel>, #tpu.dimension_semantics<parallel>], iteration_bounds = array<i64: 2, 1>, scalar_prefetch = 0 : i64, scratch_operands = 0 : i64, tpu.core_type = #tpu.core_type<tc>, window_params = [{transform_indices = @transform_0, window_bounds = array<i64: 1, 3, 4>}, {transform_indices = @transform_1, window_bounds = array<i64: 1, 4, 256>}, {transform_indices = @transform_2, window_bounds = array<i64: 1, 2, 256>}]} {
    %c0 = arith.constant 0 : index
    %c0_0 = arith.constant 0 : index
    %c0_1 = arith.constant 0 : index
    %0 = vector.load %arg2[%c0, %c0_0, %c0_1] : memref<1x3x4xf32, #tpu.memory_space<vmem>>, vector<1x3x4xf32>
    %1 = vector.shape_cast %0 : vector<1x3x4xf32> to vector<3x4xf32>
    %c0_2 = arith.constant 0 : index
    %c0_3 = arith.constant 0 : index
    %c0_4 = arith.constant 0 : index
    %2 = vector.load %arg3[%c0_2, %c0_3, %c0_4] : memref<1x4x256xf32, #tpu.memory_space<vmem>>, vector<1x4x256xf32>
    %3 = vector.shape_cast %2 : vector<1x4x256xf32> to vector<4x256xf32>
    %4 = vector.extract_strided_slice %1 {offsets = [0, 0], sizes = [3, 1], strides = [1, 1]} : vector<3x4xf32> to vector<3x1xf32>
    %5 = vector.extract_strided_slice %3 {offsets = [0, 0], sizes = [1, 256], strides = [1, 1]} : vector<4x256xf32> to vector<1x256xf32>
    %6 = vector.broadcast %4 : vector<3x1xf32> to vector<3x256xf32>
    %7 = vector.broadcast %5 : vector<1x256xf32> to vector<3x256xf32>
    %8 = arith.mulf %6, %7 : vector<3x256xf32>
    %9 = vector.extract_strided_slice %1 {offsets = [0, 1], sizes = [3, 1], strides = [1, 1]} : vector<3x4xf32> to vector<3x1xf32>
    %10 = vector.extract_strided_slice %3 {offsets = [1, 0], sizes = [1, 256], strides = [1, 1]} : vector<4x256xf32> to vector<1x256xf32>
    %11 = vector.broadcast %9 : vector<3x1xf32> to vector<3x256xf32>
    %12 = vector.broadcast %10 : vector<1x256xf32> to vector<3x256xf32>
    %13 = arith.mulf %11, %12 : vector<3x256xf32>
    %14 = arith.addf %8, %13 : vector<3x256xf32>
    %15 = vector.extract_strided_slice %1 {offsets = [0, 2], sizes = [3, 1], strides = [1, 1]} : vector<3x4xf32> to vector<3x1xf32>
    %16 = vector.extract_strided_slice %3 {offsets = [2, 0], sizes = [1, 256], strides = [1, 1]} : vector<4x256xf32> to vector<1x256xf32>
    %17 = vector.broadcast %15 : vector<3x1xf32> to vector<3x256xf32>
    %18 = vector.broadcast %16 : vector<1x256xf32> to vector<3x256xf32>
    %19 = arith.mulf %17, %18 : vector<3x256xf32>
    %20 = arith.addf %14, %19 : vector<3x256xf32>
    %21 = vector.extract_strided_slice %1 {offsets = [0, 3], sizes = [3, 1], strides = [1, 1]} : vector<3x4xf32> to vector<3x1xf32>
    %22 = vector.extract_strided_slice %3 {offsets = [3, 0], sizes = [1, 256], strides = [1, 1]} : vector<4x256xf32> to vector<1x256xf32>
    %23 = vector.broadcast %21 : vector<3x1xf32> to vector<3x256xf32>
    %24 = vector.broadcast %22 : vector<1x256xf32> to vector<3x256xf32>
    %25 = arith.mulf %23, %24 : vector<3x256xf32>
    %26 = arith.addf %20, %25 : vector<3x256xf32>
    %27 = vector.extract_strided_slice %26 {offsets = [2, 0], sizes = [1, 256], strides = [1, 1]} : vector<3x256xf32> to vector<1x256xf32>
    %cst = arith.constant 1.000000e-07 : f32
    %28 = vector.broadcast %cst : f32 to vector<1x256xf32>
    %29 = arith.addf %27, %28 : vector<1x256xf32>
    %30 = tpu.reciprocal %29 : vector<1x256xf32> -> vector<1x256xf32>
    %31 = vector.extract_strided_slice %26 {offsets = [0, 0], sizes = [1, 256], strides = [1, 1]} : vector<3x256xf32> to vector<1x256xf32>
    %32 = arith.mulf %31, %30 : vector<1x256xf32>
    %33 = vector.extract_strided_slice %26 {offsets = [1, 0], sizes = [1, 256], strides = [1, 1]} : vector<3x256xf32> to vector<1x256xf32>
    %34 = arith.mulf %33, %30 : vector<1x256xf32>
    %c256_i32 = arith.constant 256 : i32
    %35 = arith.muli %arg1, %c256_i32 : i32
    %36 = tpu.iota {dimensions = array<i32: 1>} : vector<1x256xi32>
    %37 = vector.broadcast %35 : i32 to vector<1x256xi32>
    %38 = arith.addi %36, %37 : vector<1x256xi32>
    %39 = arith.sitofp %38 : vector<1x256xi32> to vector<1x256xf32>
    %cst_5 = arith.constant 6.250000e-02 : f32
    %40 = vector.broadcast %cst_5 : f32 to vector<1x256xf32>
    %41 = arith.mulf %39, %40 : vector<1x256xf32>
    %42 = math.floor %41 : vector<1x256xf32>
    %cst_6 = arith.constant 1.600000e+01 : f32
    %43 = vector.broadcast %cst_6 : f32 to vector<1x256xf32>
    %44 = arith.mulf %42, %43 : vector<1x256xf32>
    %45 = arith.subf %39, %44 : vector<1x256xf32>
    %cst_7 = arith.constant 0.000000e+00 : f32
    %46 = vector.broadcast %cst_7 : f32 to vector<1x256xf32>
    %47 = arith.cmpf olt, %45, %46 : vector<1x256xf32>
    %cst_8 = arith.constant 1.000000e+00 : f32
    %48 = vector.broadcast %cst_8 : f32 to vector<1x256xf32>
    %49 = arith.subf %42, %48 : vector<1x256xf32>
    %50 = arith.select %47, %49, %42 : vector<1x256xi1>, vector<1x256xf32>
    %cst_9 = arith.constant 1.600000e+01 : f32
    %51 = vector.broadcast %cst_9 : f32 to vector<1x256xf32>
    %52 = arith.cmpf oge, %45, %51 : vector<1x256xf32>
    %cst_10 = arith.constant 1.000000e+00 : f32
    %53 = vector.broadcast %cst_10 : f32 to vector<1x256xf32>
    %54 = arith.addf %50, %53 : vector<1x256xf32>
    %55 = arith.select %52, %54, %50 : vector<1x256xi1>, vector<1x256xf32>
    %cst_11 = arith.constant 1.600000e+01 : f32
    %56 = vector.broadcast %cst_11 : f32 to vector<1x256xf32>
    %57 = arith.mulf %55, %56 : vector<1x256xf32>
    %58 = arith.subf %39, %57 : vector<1x256xf32>
    %59 = arith.subf %34, %55 : vector<1x256xf32>
    %60 = arith.subf %32, %58 : vector<1x256xf32>
    %61 = tpu.concatenate %59, %60 in 0 : vector<1x256xf32>, vector<1x256xf32> -> vector<2x256xf32>
    %c0_12 = arith.constant 0 : index
    %c0_13 = arith.constant 0 : index
    %c0_14 = arith.constant 0 : index
    %62 = vector.load %arg4[%c0_12, %c0_13, %c0_14] : memref<1x2x256xf32, #tpu.memory_space<vmem>>, vector<1x2x256xf32>
    %63 = vector.shape_cast %62 : vector<1x2x256xf32> to vector<2x256xf32>
    %64 = vector.shape_cast %61 : vector<2x256xf32> to vector<1x2x256xf32>
    tpu.vector_store %arg4[%c0_12, %c0_13, %c0_14], %64 {strides = array<i32>} : memref<1x2x256xf32, #tpu.memory_space<vmem>>, vector<1x2x256xf32>,
    return
  }
  func.func @transform_0(%arg0: i32, %arg1: i32) -> (i32, i32, i32) {
    %c0_i32 = arith.constant 0 : i32
    %c0_i32_0 = arith.constant 0 : i32
    %c0_i32_1 = arith.constant 0 : i32
    return %arg0, %c0_i32, %c0_i32_0 : i32, i32, i32
  }
  func.func @transform_1(%arg0: i32, %arg1: i32) -> (i32, i32, i32) {
    %c0_i32 = arith.constant 0 : i32
    %c0_i32_0 = arith.constant 0 : i32
    return %arg0, %c0_i32, %arg1 : i32, i32, i32
  }
  func.func @transform_2(%arg0: i32, %arg1: i32) -> (i32, i32, i32) {
    %c0_i32 = arith.constant 0 : i32
    %c0_i32_0 = arith.constant 0 : i32
    return %arg0, %c0_i32, %arg1 : i32, i32, i32
  }
}

</mosaic_0001>

<bundles_post_ra>
// kernel: optical_flow.1
= control target key start
LH: loop header
LB: loop body
LE: loop exit
PB: predicated region body
PF: predicated region fallthrough
CT: control target
= control target key end

     0   :  { %s584_s9 = smov 0   ;;  %s586_s10 = smov 0   ;;  %s638_s0 = inlined_call_operand.vmem [shape: f32[2,3,4], index: 0, kind: input, shape index: {}]   ;;  %s639_s1 = inlined_call_operand.vmem [shape: f32[2,4,256], index: 1, kind: input, shape index: {}]   ;;  %s640_s2 = inlined_call_operand.vmem [shape: f32[2,2,256], index: 2, kind: output, shape index: {}]  }
   0x1   :  { %s588_s11 = smov 0  }
   0x2 LB: > { %s24_s12 = sadd.s32 1, %s559_s10  ;;  %p491_p0 = scmp.ge.s32.totalorder %s563_s11, 1  ;;  %s563_s11 = sphi %s588_s11, %s12_s11   ;;  %s559_s10 = sphi %s586_s10, %s642_s10   ;;  %s555_s9 = sphi %s584_s9, %s641_s9  }
   0x3   : > { %p26_p1 = scmp.ge.s32.totalorder %s24_s12, 2  ;;  %p142_p2 = scmp.lt.s32.totalorder %s563_s11, 3 }
   0x5   : > { %s644_s12 = smov (%p26_p1, %s24_s12), 0  ;;  %p143_p3 = pnand %p491_p0, %p142_p2 }
   0x6   : > { %p176_p4 = scmp.lt.s32.totalorder (!%p143_p3), %s555_s9, 1  ;;  %v565_v0 = vmov (!%p143_p3), 0   ;;  %v566_v1 = vmov (!%p143_p3), 2   ;;  %v567_v3 = vmov (!%p143_p3), 1   ;;  %v568_v4 = vmov (!%p143_p3), 3  }
   0x7   : > { %146 = sbr.rel (%p143_p3) target bundleno = 185 (0xb9), region = 28  ;;  %532 = vset.pattern.permute.xlu0 (!%p143_p3), %v565_v0  ;;  %534 = vset.pattern.permute.xlu1 (!%p143_p3), %v566_v1  ;;  %v208_v5 = vlaneseq (!%p143_p3)  ;;  %vm373_vm4 = vcmask (!%p143_p3), 1040384  }
   0x9   : > { %v326_v6 = vand.u32 (!%p143_p3), 127, %v208_v5  ;;  %v209_v9 = vshrl.u32 (!%p143_p3), %v208_v5, 7 }
   0xb   : > { %v327_v7 = vadd.s32 (!%p143_p3), 128, %v326_v6  ;;  %v611_v8 = vcvt.s32.f32 (!%p143_p3), %v326_v6  ;;  %v210_v12 = vsub.s32 (!%p143_p3), 0, %v209_v9  ;;  %v214_v13 = vsub.s32 (!%p143_p3), 4, %v209_v9 }
   0xc   : > { %v234_v14 = vsub.s32 (!%p143_p3), 1, %v209_v9  ;;  %v238_v15 = vsub.s32 (!%p143_p3), 5, %v209_v9  ;;  %v260_v17 = vsub.s32 (!%p143_p3), 2, %v209_v9  ;;  %v264_v18 = vsub.s32 (!%p143_p3), 6, %v209_v9 }
   0xd   : > { %v613_v10 = vcvt.s32.f32 (!%p143_p3), %v327_v7  ;;  %v333_v11 = vmul.f32 (!%p143_p3), 0.0625, %v611_v8  ;;  %v286_v20 = vsub.s32 (!%p143_p3), 3, %v209_v9  ;;  %v290_v21 = vsub.s32 (!%p143_p3), 7, %v209_v9 }
   0xe   : > { %s646_s9 = smov (!%p176_p4, %s555_s9), 1 }
   0xf   : > { %s492_s13 = sshll.u32 %s646_s9, 2  ;;  %s502_s17 = sshll.u32 %s646_s9, 3  ;;  %v334_v19 = vmul.f32 0.0625, %v613_v10  ;;  %v335_v22 = vfloor.f32 %v333_v11 }
  0x10   : > { %s179_s16 = scalar_lea.vmem %s638_s0, %s492_s13  ;;  %s188_s20 = scalar_lea.vmem %s639_s1, %s502_s17 }
  0x11   : > { %v200_v2 = vld [vmem:[%s179_s16] sm:$0x7]  ;;  %v336_v29 = vfloor.f32 %v334_v19  ;;  %v337_v34 = vmul.f32 16.0, %v335_v22  ;;  %v497_v58 = vadd.f32 -1.0, %v335_v22  ;;  %s198_s23 = scalar_lea.vmem %s640_s2, %s492_s13 }
  0x12   : > { %204 = vperm.xlu0 %532, %v200_v2   ;;  %255 = vperm.xlu1 %534, %v200_v2   ;;  %v201_v16 = vld [vmem:[%s188_s20] sm:$0xff] }
  0x13   : > { %v211_v23 = vrot.slane %v201_v16, %v210_v12  ;;  %v215_v24 = vrot.slane %v201_v16, %v214_v13  ;;  %v235_v25 = vrot.slane %v201_v16, %v234_v14  ;;  %v239_v26 = vrot.slane %v201_v16, %v238_v15 }
  0x14   : > { %v261_v27 = vrot.slane %v201_v16, %v260_v17  ;;  %v265_v28 = vrot.slane %v201_v16, %v264_v18  ;;  %v287_v32 = vrot.slane %v201_v16, %v286_v20  ;;  %v291_v33 = vrot.slane %v201_v16, %v290_v21 }
  0x15   : > { %v221_v35 = vrot.slane %v211_v23, %v210_v12  ;;  %v225_v36 = vrot.slane %v215_v24, %v210_v12  ;;  %v245_v37 = vrot.slane %v235_v25, %v234_v14  ;;  %v249_v38 = vrot.slane %v239_v26, %v234_v14 }
  0x16   : > { %533 = vset.pattern.permute.xlu0 %v567_v3  ;;  %535 = vset.pattern.permute.xlu1 %v568_v4  ;;  %v271_v39 = vrot.slane %v261_v27, %v260_v17  ;;  %v275_v40 = vrot.slane %v265_v28, %v260_v17  ;;  %v338_v41 = vmul.f32 16.0, %v336_v29  ;;  %v297_v42 = vrot.slane %v287_v32, %v286_v20 }
  0x17   : > { %229 = vperm.xlu0 %533, %v200_v2   ;;  %281 = vperm.xlu1 %535, %v200_v2   ;;  %v301_v43 = vrot.slane %v291_v33, %v286_v20  ;;  %v339_v45 = vsub.f32 %v611_v8, %v337_v34  ;;  %v498_v59 = vadd.f32 -1.0, %v336_v29 }
  0x18   : > { %v340_v53 = vsub.f32 %v613_v10, %v338_v41 }
  0x19   : > { %vm341_vm0 = vcmp.lt.f32.partialorder %v339_v45, 0.0  ;;  %vm347_vm2 = vcmp.ge.f32.partialorder %v339_v45, 16.0 }
  0x1a   : > { %vm342_vm1 = vcmp.lt.f32.partialorder %v340_v53, 0.0  ;;  %v345_v0 = vsel %vm341_vm0, %v497_v58, %v335_v22  ;;  %vm348_vm3 = vcmp.ge.f32.partialorder %v340_v53, 16.0 }
  0x1b   : > { %536 = vset.pattern.permute.xlu0 %v568_v4  ;;  %v346_v1 = vsel %vm342_vm1, %v498_v59, %v336_v29  ;;  %v349_v4 = vadd.f32 1.0, %v345_v0 }
  0x1c   : > { %v350_v5 = vadd.f32 1.0, %v346_v1 }
  0x1d   : > { %v351_v6 = vsel %vm347_vm2, %v349_v4, %v345_v0 }
  0x1e   : > { %v352_v7 = vsel %vm348_vm3, %v350_v5, %v346_v1  ;;  %v353_v9 = vmul.f32 16.0, %v351_v6 }
  0x1f   : > { %v354_v11 = vmul.f32 16.0, %v352_v7 }
  0x20   : > { %v355_v14 = vsub.f32 %v611_v8, %v353_v9 }
  0x21   : > { %v356_v17 = vsub.f32 %v613_v10, %v354_v11 }
  0x91   : > { %v205_v30 = vpop.permute.xlu0 %204  ;;  %v256_v31 = vpop.permute.xlu1 %255 }
  0x92   : > { %v226_v47 = vmul.f32 %v221_v35, %v205_v30  ;;  %v227_v48 = vmul.f32 %v225_v36, %v205_v30  ;;  %v276_v51 = vmul.f32 %v271_v39, %v256_v31  ;;  %v277_v52 = vmul.f32 %v275_v40, %v256_v31 }
  0x96   : > { %v230_v44 = vpop.permute.xlu0 %229  ;;  %v282_v46 = vpop.permute.xlu1 %281 }
  0x97   : > { %v250_v49 = vmul.f32 %v245_v37, %v230_v44  ;;  %v251_v50 = vmul.f32 %v249_v38, %v230_v44  ;;  %v302_v56 = vmul.f32 %v297_v42, %v282_v46  ;;  %v303_v57 = vmul.f32 %v301_v43, %v282_v46 }
  0x99   : > { %v252_v54 = vadd.f32 %v250_v49, %v226_v47  ;;  %v253_v55 = vadd.f32 %v251_v50, %v227_v48 }
  0x9b   : > { %v278_v60 = vadd.f32 %v276_v51, %v252_v54  ;;  %v279_v61 = vadd.f32 %v277_v52, %v253_v55 }
  0x9d   : > { %v304_v62 = vadd.f32 %v302_v56, %v278_v60  ;;  %v305_v63 = vadd.f32 %v303_v57, %v279_v61 }
  0x9f   : > { %v306_v2 = vadd.f32 1e-07, %v304_v62  ;;  %v307_v3 = vadd.f32 1e-07, %v305_v63 }
  0xa1   : > { %537 = vrcp.f32 %v306_v2 }
  0xa2   : > { %539 = vrcp.f32 %v307_v3 }
  0xab   : > { %v538_v12 = vpop.eup %537 }
  0xac   : > { %v540_v13 = vpop.eup %539  ;;  %v312_v15 = vrot.slane %v538_v12, 2  ;;  %v318_v16 = vrot.slane %v538_v12, 1 }
  0xad   : > { %v313_v18 = vrot.slane %v540_v13, 2  ;;  %v319_v19 = vrot.slane %v540_v13, 1 }
  0xae   : > { %v316_v20 = vmul.f32 %v312_v15, %v304_v62  ;;  %v322_v21 = vmul.f32 %v318_v16, %v304_v62 }
  0xaf   : > { %v317_v22 = vmul.f32 %v313_v18, %v305_v63  ;;  %v323_v23 = vmul.f32 %v319_v19, %v305_v63 }
  0xb0   : > { %v357_v24 = vsub.f32 %v322_v21, %v351_v6  ;;  %v359_v25 = vsub.f32 %v316_v20, %v355_v14 }
  0xb1   : > { %v358_v26 = vsub.f32 %v323_v23, %v352_v7  ;;  %v360_v27 = vsub.f32 %v317_v22, %v356_v17 }
  0xb2   : > { %v363_v28 = vrot.slane %v357_v24, 1  ;;  %v369_v29 = vrot.slane %v359_v25, 7 }
  0xb3   : > { %v364_v30 = vrot.slane %v358_v26, 1  ;;  %v370_v8 = vrot.slane %v360_v27, 7 }
  0xb4   : > { %v374_v31 = vsel %vm373_vm4, %v363_v28, %v369_v29 }
  0xb5   : > { %v375_v10 = vsel %vm373_vm4, %v364_v30, %v370_v8 }
  0xb6   : > { %v378_v32 = vcombine.low %v374_v31, %v375_v10 }
  0xb8   : > { %499 = vst.sshfl [vmem:[%s198_s23] sm:$0x33 pattern:$0x76325410] %v378_v32 }
  0xb9 PF: > { %s12_s11 = sadd.s32 1, %s563_s11   ;;  %s641_s9 = smov %s559_s10 }
  0xba   : > { %p9_p5 = scmp.ge.s32.totalorder %s12_s11, 4   ;;  %s642_s10 = smov %s644_s12 }
  0xbc   :  { %11 = sbr.rel (!%p9_p5) target bundleno = 2 (0x2), region = 61 }

</bundles_post_ra>
